<compile_context>
chip_gen: v6e
topology: v6e:2x2x1
jax: 0.10.0
libtpu: 0.0.40
codegen_flags: <defaults>
</compile_context>

<pallas_src>
import functools

import jax
import jax.numpy as jnp
from jax.experimental import pallas as pl
from jax.experimental.pallas import tpu as pltpu

IN_FEATURES = 28 * 28          # 784
H1, H2 = 128, 64
OUT_FEATURES = 10
N_PAD = 128                    # lane-dense padded fc3 output width
SUBLANE = 8


def _cdiv(a, b):
    return (a + b - 1) // b


def _round_up(x, m):
    return ((x + m - 1) // m) * m


def _choose_tiling(batch, block_b):
    """Pick a batch tile size that (a) avoids whole-tile padding waste and
    (b) yields >= 2 grid steps when possible so both v7x TensorCores get work."""
    desired_tiles = max(1, _cdiv(batch, block_b))
    if batch >= 2 * SUBLANE:
        desired_tiles = max(desired_tiles, 2)
    tb = _round_up(_cdiv(batch, desired_tiles), SUBLANE)
    tb = max(SUBLANE, min(tb, _round_up(block_b, SUBLANE)))
    b_padded = _round_up(batch, tb)
    return tb, b_padded


def _mlp_kernel(x_ref, w1_ref, b1_ref, w2_ref, b2_ref, w3_ref, b3_ref, o_ref):
    # x_ref: (TB, 784) f32; weights bf16; biases f32; o_ref: (TB, 128) bf16.
    x = x_ref[...].astype(jnp.bfloat16)                 # in-kernel cast (free VALU)

    h1 = jnp.dot(x, w1_ref[...], preferred_element_type=jnp.float32)
    h1 = jnp.maximum(h1 + b1_ref[...], 0.0).astype(jnp.bfloat16)   # relu(fc1)

    h2 = jnp.dot(h1, w2_ref[...], preferred_element_type=jnp.float32)
    h2 = jnp.maximum(h2 + b2_ref[...], 0.0).astype(jnp.bfloat16)   # relu(fc2)

    h3 = jnp.dot(h2, w3_ref[...], preferred_element_type=jnp.float32)
    o_ref[...] = (h3 + b3_ref[...]).astype(o_ref.dtype)            # fc3, bf16 store


@functools.partial(jax.jit, static_argnames=("block_b",))
def simple_nn_forward(x, params, *, block_b=2048):
    """x: (B, 1, 28, 28) or (B, 784) float32. Returns (B, 10) float32."""
    w1, b1, w2, b2, w3, b3 = params
    x2d = x.reshape(-1, IN_FEATURES).astype(jnp.float32)   # matches x.view(-1, 784)
    B = x2d.shape[0]

    # Weights in bf16 (MXU operands); fc3 padded lane-dense 10 -> 128 with zeros.
    w1b = w1.astype(jnp.bfloat16)
    w2b = w2.astype(jnp.bfloat16)
    w3p = jnp.pad(w3, ((0, 0), (0, N_PAD - OUT_FEATURES))).astype(jnp.bfloat16)
    b3p = jnp.pad(b3, ((0, 0), (0, N_PAD - OUT_FEATURES)))

    # Adaptive batch tiling (no whole-tile padding, >=2 tiles when B >= 16).
    tb, b_padded = _choose_tiling(B, block_b)
    if b_padded != B:
        x2d = jnp.pad(x2d, ((0, b_padded - B), (0, 0)))
    num_tiles = b_padded // tb

    moving = lambda shape: pl.BlockSpec(shape, lambda i: (i, 0))
    resident = lambda shape: pl.BlockSpec(shape, lambda i: (0, 0))

    out_padded = pl.pallas_call(
        _mlp_kernel,
        out_shape=jax.ShapeDtypeStruct((b_padded, N_PAD), jnp.bfloat16),
        grid=(num_tiles,),
        in_specs=[
            moving((tb, IN_FEATURES)),            # x tile streams per step (f32)
            resident((IN_FEATURES, H1)), resident((1, H1)),
            resident((H1, H2)),          resident((1, H2)),
            resident((H2, N_PAD)),       resident((1, N_PAD)),
        ],
        out_specs=moving((tb, N_PAD)),
        compiler_params=pltpu.CompilerParams(
            dimension_semantics=("parallel",),
            vmem_limit_bytes=48 * 1024 * 1024,
        ),
    )(x2d, w1b, b1, w2b, b2, w3p, b3p)

    # Slice off padding; return f32 to preserve the original interface.
    return out_padded[:B, :OUT_FEATURES].astype(jnp.float32)


def init_params(key):
    """Deterministic init matching nn.Linear shapes (stored transposed as (in, out))."""
    def linear(key, fan_in, fan_out):
        kw, kb = jax.random.split(key)
        bound = 1.0 / jnp.sqrt(fan_in)
        w = jax.random.uniform(kw, (fan_in, fan_out), jnp.float32, -bound, bound)
        b = jax.random.uniform(kb, (1, fan_out), jnp.float32, -bound, bound)
        return w, b

    k1, k2, k3 = jax.random.split(key, 3)
    w1, b1 = linear(k1, IN_FEATURES, H1)
    w2, b2 = linear(k2, H1, H2)
    w3, b3 = linear(k3, H2, OUT_FEATURES)
    return (w1, b1, w2, b2, w3, b3)


def _reference(x2d, params):
    """Full-precision reference of the original PyTorch module."""
    w1, b1, w2, b2, w3, b3 = params
    h = jnp.maximum(x2d @ w1 + b1, 0.0)
    h = jnp.maximum(h @ w2 + b2, 0.0)
    return h @ w3 + b3


def _reference_quantized(x2d, params):
    """Reference with the same bf16 operand quantization and bf16 final store."""
    w1, b1, w2, b2, w3, b3 = params
    q = lambda a: a.astype(jnp.bfloat16).astype(jnp.float32)
    h = jnp.maximum(q(x2d) @ q(w1) + b1, 0.0)
    h = jnp.maximum(q(h) @ q(w2) + b2, 0.0)
    out = q(h) @ q(w3) + b3
    return q(out)


if __name__ == "__main__":
    key = jax.random.PRNGKey(0)
    k_params, k_x1, k_x2 = jax.random.split(key, 3)

    params = init_params(k_params)

    # MNIST-like input: batch=2, (B, 1, 28, 28); the forward flattens it.
    x = jax.random.normal(k_x1, (2, 1, 28, 28), jnp.float32)
    out = jax.block_until_ready(simple_nn_forward(x, params))
    assert out.shape == (2, 10)

    x2d = x.reshape(-1, IN_FEATURES)
    # Quantization-matched reference (tight-ish tolerance; 1 bf16 ulp slack).
    assert jnp.allclose(out, _reference_quantized(x2d, params), atol=1e-2, rtol=1e-2)
    # Full-precision reference of the original module (loose tolerance: bf16 operands).
    assert jnp.allclose(out, _reference(x2d, params), atol=5e-2, rtol=5e-2)

    # Second small check exercising the multi-tile / non-multiple-of-8 batch path.
    xb = jax.random.normal(k_x2, (37, 1, 28, 28), jnp.float32)
    outb = jax.block_until_ready(simple_nn_forward(xb, params))
    assert outb.shape == (37, 10)
    xb2d = xb.reshape(-1, IN_FEATURES)
    assert jnp.allclose(outb, _reference_quantized(xb2d, params), atol=1e-2, rtol=1e-2)
    assert jnp.allclose(outb, _reference(xb2d, params), atol=5e-2, rtol=5e-2)

    print("KERNEL_OK")
</pallas_src>

<mosaic_0001>
module attributes {stable_mosaic.version = 11 : i64} {
  func.func @_mlp_kernel(%arg0: i32, %arg1: memref<8x784xf32, #tpu.memory_space<vmem>>, %arg2: memref<784x128xbf16, #tpu.memory_space<vmem>>, %arg3: memref<1x128xf32, #tpu.memory_space<vmem>>, %arg4: memref<128x64xbf16, #tpu.memory_space<vmem>>, %arg5: memref<1x64xf32, #tpu.memory_space<vmem>>, %arg6: memref<64x128xbf16, #tpu.memory_space<vmem>>, %arg7: memref<1x128xf32, #tpu.memory_space<vmem>>, %arg8: memref<8x128xbf16, #tpu.memory_space<vmem>>) attributes {dimension_semantics = [#tpu.dimension_semantics<parallel>], iteration_bounds = array<i64: 1>, scalar_prefetch = 0 : i64, scratch_operands = 0 : i64, tpu.core_type = #tpu.core_type<tc>, window_params = [{transform_indices = @transform_0, window_bounds = array<i64: 8, 784>}, {pipeline_mode = #tpu.pipeline_mode<synchronous>, transform_indices = @transform_1, window_bounds = array<i64: 784, 128>}, {pipeline_mode = #tpu.pipeline_mode<synchronous>, transform_indices = @transform_2, window_bounds = array<i64: 1, 128>}, {pipeline_mode = #tpu.pipeline_mode<synchronous>, transform_indices = @transform_3, window_bounds = array<i64: 128, 64>}, {pipeline_mode = #tpu.pipeline_mode<synchronous>, transform_indices = @transform_4, window_bounds = array<i64: 1, 64>}, {pipeline_mode = #tpu.pipeline_mode<synchronous>, transform_indices = @transform_5, window_bounds = array<i64: 64, 128>}, {pipeline_mode = #tpu.pipeline_mode<synchronous>, transform_indices = @transform_6, window_bounds = array<i64: 1, 128>}, {transform_indices = @transform_7, window_bounds = array<i64: 8, 128>}]} {
    %c0 = arith.constant 0 : index
    %c0_0 = arith.constant 0 : index
    %0 = vector.load %arg1[%c0, %c0_0] : memref<8x784xf32, #tpu.memory_space<vmem>>, vector<8x784xf32>
    %1 = arith.truncf %0 : vector<8x784xf32> to vector<8x784xbf16>
    %c0_1 = arith.constant 0 : index
    %c0_2 = arith.constant 0 : index
    %2 = vector.load %arg2[%c0_1, %c0_2] : memref<784x128xbf16, #tpu.memory_space<vmem>>, vector<784x128xbf16>
    %cst = arith.constant dense<0.000000e+00> : vector<8x128xf32>
    %3 = tpu.matmul %1, %2, %cst {dimension_numbers = #tpu.dot_dimension_numbers<[1], [0], [0], [1], [0, 0, 1, 1], [], []>} : vector<8x784xbf16>, vector<784x128xbf16>, vector<8x128xf32> -> vector<8x128xf32>
    %c0_3 = arith.constant 0 : index
    %c0_4 = arith.constant 0 : index
    %4 = vector.load %arg3[%c0_3, %c0_4] : memref<1x128xf32, #tpu.memory_space<vmem>>, vector<1x128xf32>
    %5 = vector.broadcast %4 : vector<1x128xf32> to vector<8x128xf32>
    %6 = arith.addf %3, %5 : vector<8x128xf32>
    %cst_5 = arith.constant 0.000000e+00 : f32
    %7 = vector.broadcast %cst_5 : f32 to vector<8x128xf32>
    %8 = arith.maximumf %6, %7 : vector<8x128xf32>
    %9 = arith.truncf %8 : vector<8x128xf32> to vector<8x128xbf16>
    %c0_6 = arith.constant 0 : index
    %c0_7 = arith.constant 0 : index
    %10 = vector.load %arg4[%c0_6, %c0_7] : memref<128x64xbf16, #tpu.memory_space<vmem>>, vector<128x64xbf16>
    %cst_8 = arith.constant dense<0.000000e+00> : vector<8x64xf32>
    %11 = tpu.matmul %9, %10, %cst_8 {dimension_numbers = #tpu.dot_dimension_numbers<[1], [0], [0], [1], [0, 0, 1, 1], [], []>} : vector<8x128xbf16>, vector<128x64xbf16>, vector<8x64xf32> -> vector<8x64xf32>
    %c0_9 = arith.constant 0 : index
    %c0_10 = arith.constant 0 : index
    %12 = vector.load %arg5[%c0_9, %c0_10] : memref<1x64xf32, #tpu.memory_space<vmem>>, vector<1x64xf32>
    %13 = vector.broadcast %12 : vector<1x64xf32> to vector<8x64xf32>
    %14 = arith.addf %11, %13 : vector<8x64xf32>
    %cst_11 = arith.constant 0.000000e+00 : f32
    %15 = vector.broadcast %cst_11 : f32 to vector<8x64xf32>
    %16 = arith.maximumf %14, %15 : vector<8x64xf32>
    %17 = arith.truncf %16 : vector<8x64xf32> to vector<8x64xbf16>
    %c0_12 = arith.constant 0 : index
    %c0_13 = arith.constant 0 : index
    %18 = vector.load %arg6[%c0_12, %c0_13] : memref<64x128xbf16, #tpu.memory_space<vmem>>, vector<64x128xbf16>
    %cst_14 = arith.constant dense<0.000000e+00> : vector<8x128xf32>
    %19 = tpu.matmul %17, %18, %cst_14 {dimension_numbers = #tpu.dot_dimension_numbers<[1], [0], [0], [1], [0, 0, 1, 1], [], []>} : vector<8x64xbf16>, vector<64x128xbf16>, vector<8x128xf32> -> vector<8x128xf32>
    %c0_15 = arith.constant 0 : index
    %c0_16 = arith.constant 0 : index
    %20 = vector.load %arg7[%c0_15, %c0_16] : memref<1x128xf32, #tpu.memory_space<vmem>>, vector<1x128xf32>
    %21 = vector.broadcast %20 : vector<1x128xf32> to vector<8x128xf32>
    %22 = arith.addf %19, %21 : vector<8x128xf32>
    %23 = arith.truncf %22 : vector<8x128xf32> to vector<8x128xbf16>
    %c0_17 = arith.constant 0 : index
    %c0_18 = arith.constant 0 : index
    %24 = vector.load %arg8[%c0_17, %c0_18] : memref<8x128xbf16, #tpu.memory_space<vmem>>, vector<8x128xbf16>
    tpu.vector_store %arg8[%c0_17, %c0_18], %23 {strides = array<i32>} : memref<8x128xbf16, #tpu.memory_space<vmem>>, vector<8x128xbf16>,
    return
  }
  func.func @transform_0(%arg0: i32) -> (i32, i32) {
    %c0_i32 = arith.constant 0 : i32
    %c0_i32_0 = arith.constant 0 : i32
    return %arg0, %c0_i32 : i32, i32
  }
  func.func @transform_1(%arg0: i32) -> (i32, i32) {
    %c0_i32 = arith.constant 0 : i32
    %c0_i32_0 = arith.constant 0 : i32
    %c0_i32_1 = arith.constant 0 : i32
    return %c0_i32, %c0_i32_0 : i32, i32
  }
  func.func @transform_2(%arg0: i32) -> (i32, i32) {
    %c0_i32 = arith.constant 0 : i32
    %c0_i32_0 = arith.constant 0 : i32
    %c0_i32_1 = arith.constant 0 : i32
    return %c0_i32, %c0_i32_0 : i32, i32
  }
  func.func @transform_3(%arg0: i32) -> (i32, i32) {
    %c0_i32 = arith.constant 0 : i32
    %c0_i32_0 = arith.constant 0 : i32
    %c0_i32_1 = arith.constant 0 : i32
    return %c0_i32, %c0_i32_0 : i32, i32
  }
  func.func @transform_4(%arg0: i32) -> (i32, i32) {
    %c0_i32 = arith.constant 0 : i32
    %c0_i32_0 = arith.constant 0 : i32
    %c0_i32_1 = arith.constant 0 : i32
    return %c0_i32, %c0_i32_0 : i32, i32
  }
  func.func @transform_5(%arg0: i32) -> (i32, i32) {
    %c0_i32 = arith.constant 0 : i32
    %c0_i32_0 = arith.constant 0 : i32
    %c0_i32_1 = arith.constant 0 : i32
    return %c0_i32, %c0_i32_0 : i32, i32
  }
  func.func @transform_6(%arg0: i32) -> (i32, i32) {
    %c0_i32 = arith.constant 0 : i32
    %c0_i32_0 = arith.constant 0 : i32
    %c0_i32_1 = arith.constant 0 : i32
    return %c0_i32, %c0_i32_0 : i32, i32
  }
  func.func @transform_7(%arg0: i32) -> (i32, i32) {
    %c0_i32 = arith.constant 0 : i32
    %c0_i32_0 = arith.constant 0 : i32
    return %arg0, %c0_i32 : i32, i32
  }
}

</mosaic_0001>

<bundles_post_ra>
// kernel: simple_nn_forward.1
= control target key start
LH: loop header
LB: loop body
LE: loop exit
PB: predicated region body
PF: predicated region fallthrough
CT: control target
= control target key end

     0   :  { %v1057_v44 = vmov 0.0   ;;  %vm1058_vm0 = vmmov 0   ;;  %vm440_vm1 = vcmask 130048   ;;  %vm758_vm2 = vcmask 523264   ;;  %s1334_s1 = inlined_call_operand.vmem [shape: bf16[784,128], index: 1, kind: input, shape index: {}]   ;;  %s1335_s0 = inlined_call_operand.vmem [shape: f32[8,784], index: 0, kind: input, shape index: {}]   ;;  %s1336_s3 = inlined_call_operand.vmem [shape: bf16[128,64], index: 3, kind: input, shape index: {}]   ;;  %s1337_s5 = inlined_call_operand.vmem [shape: bf16[64,128], index: 5, kind: input, shape index: {}]   ;;  %s1338_s2 = inlined_call_operand.vmem [shape: f32[1,128], index: 2, kind: input, shape index: {}]   ;;  %s1339_s4 = inlined_call_operand.vmem [shape: f32[1,64], index: 4, kind: input, shape index: {}]   ;;  %s1340_s6 = inlined_call_operand.vmem [shape: f32[1,128], index: 6, kind: input, shape index: {}]   ;;  %s1341_s7 = inlined_call_operand.vmem [shape: bf16[8,128], index: 7, kind: output, shape index: {}]  }
   0x1   :  { %v996_v0 = vld [vmem:[%s1334_s1 + $0x78] sm:$0xff]   ;;  %v1000_v4 = vld [vmem:[%s1334_s1 + $0x70] sm:$0xff]   ;;  %v1004_v8 = vld [vmem:[%s1334_s1 + $0x68] sm:$0xff]  }
   0x2   :  { %v997_v1 = vld [vmem:[%s1334_s1 + $0x38] sm:$0xff]   ;;  %874 = vmatprep.subr.bf16.mxu0 %v996_v0  ;;  %v1001_v5 = vld [vmem:[%s1334_s1 + $0x30] sm:$0xff]   ;;  %v1005_v9 = vld [vmem:[%s1334_s1 + $0x28] sm:$0xff]  }
   0x3   :  { %v998_v2 = vld [vmem:[%s1334_s1 + $0xf8] sm:$0xff]   ;;  %875 = vmatpush3.bf16.msra.mxu0 %v997_v1  ;;  %v1002_v6 = vld [vmem:[%s1334_s1 + $0xf0] sm:$0xff]   ;;  %v1006_v10 = vld [vmem:[%s1334_s1 + $0xe8] sm:$0xff]  }
   0x4   :  { %v999_v3 = vld [vmem:[%s1334_s1 + $0xb8] sm:$0xff]   ;;  %896 = vmatprep.subr.bf16.mxu1 %v998_v2  ;;  %876 = vmatprep.subr.bf16.mxu0 %v1000_v4  ;;  %v1003_v7 = vld [vmem:[%s1334_s1 + $0xb0] sm:$0xff]   ;;  %v1007_v11 = vld [vmem:[%s1334_s1 + $0xa8] sm:$0xff]  }
   0x5   :  { %897 = vmatpush3.bf16.msra.mxu1 %v999_v3  ;;  %v1008_v12 = vld [vmem:[%s1334_s1 + $0x60] sm:$0xff]   ;;  %v1012_v16 = vld [vmem:[%s1334_s1 + $0x58] sm:$0xff]   ;;  %v1016_v20 = vld [vmem:[%s1334_s1 + $0x50] sm:$0xff]  }
   0x6   :  { %898 = vmatprep.subr.bf16.mxu1 %v1002_v6  ;;  %v1009_v13 = vld [vmem:[%s1334_s1 + $0x20] sm:$0xff]   ;;  %v1013_v17 = vld [vmem:[%s1334_s1 + $0x18] sm:$0xff]   ;;  %v1017_v21 = vld [vmem:[%s1334_s1 + $0x10] sm:$0xff]  }
   0x7   :  { %877 = vmatpush3.bf16.msra.mxu0 %v1001_v5  ;;  %v1010_v14 = vld [vmem:[%s1334_s1 + $0xe0] sm:$0xff]   ;;  %v1014_v18 = vld [vmem:[%s1334_s1 + $0xd8] sm:$0xff]   ;;  %v1018_v22 = vld [vmem:[%s1334_s1 + $0xd0] sm:$0xff]  }
   0x8   :  { %878 = vmatprep.subr.bf16.mxu0 %v1004_v8  ;;  %v1011_v15 = vld [vmem:[%s1334_s1 + $0xa0] sm:$0xff]   ;;  %v1015_v19 = vld [vmem:[%s1334_s1 + $0x98] sm:$0xff]   ;;  %v1019_v23 = vld [vmem:[%s1334_s1 + $0x90] sm:$0xff]  }
   0x9   :  { %899 = vmatpush3.bf16.msra.mxu1 %v1003_v7  ;;  %v1020_v24 = vld [vmem:[%s1334_s1 + $0x48] sm:$0xff]   ;;  %v1024_v28 = vld [vmem:[%s1334_s1 + $0x40] sm:$0xff]   ;;  %v1028_v36 = vld [vmem:[%s1334_s1 + $0x178] sm:$0xff]  }
   0xa   :  { %900 = vmatprep.subr.bf16.mxu1 %v1006_v10  ;;  %v1021_v25 = vld [vmem:[%s1334_s1 + $0x8] sm:$0xff]   ;;  %v1025_v29 = vld [vmem:[%s1334_s1] sm:$0xff]   ;;  %v30_v37 = vld [vmem:[%s1335_s0 + $0x18] sm:$0xff] }
   0xb   :  { %879 = vmatpush3.bf16.msra.mxu0 %v1005_v9  ;;  %v1022_v26 = vld [vmem:[%s1334_s1 + $0xc8] sm:$0xff]   ;;  %v1026_v30 = vld [vmem:[%s1334_s1 + $0xc0] sm:$0xff]   ;;  %v37_v38 = vpack.c.bf16 %v30_v37, %v30_v37  ;;  %v1029_v39 = vld [vmem:[%s1334_s1 + $0x138] sm:$0xff]  }
   0xc   :  { %880 = vmatprep.subr.bf16.mxu0 %v1008_v12  ;;  %v1023_v27 = vld [vmem:[%s1334_s1 + $0x88] sm:$0xff]   ;;  %v1027_v33 = vld [vmem:[%s1334_s1 + $0x80] sm:$0xff]   ;;  %v29_v40 = vld [vmem:[%s1335_s0 + $0x10] sm:$0xff] }
   0xd   :  { %901 = vmatpush3.bf16.msra.mxu1 %v1007_v11  ;;  %v28_v31 = vld [vmem:[%s1335_s0 + $0x8] sm:$0xff]  ;;  %v27_v34 = vld [vmem:[%s1335_s0] sm:$0xff]  ;;  %516 = vmatprep.mubr.bf16.mxu1 %v37_v38  ;;  %v36_v41 = vpack.c.bf16 %v29_v40, %v29_v40  ;;  %v1030_v42 = vld [vmem:[%s1334_s1 + $0x170] sm:$0xff]  }
   0xe   :  { %902 = vmatprep.subr.bf16.mxu1 %v1010_v14  ;;  %v35_v32 = vpack.c.bf16 %v28_v31, %v28_v31  ;;  %v34_v35 = vpack.c.bf16 %v27_v34, %v27_v34  ;;  %v1031_v43 = vld [vmem:[%s1334_s1 + $0x130] sm:$0xff]   ;;  %v1032_v45 = vld [vmem:[%s1334_s1 + $0x168] sm:$0xff]   ;;  %v1034_v47 = vld [vmem:[%s1334_s1 + $0x160] sm:$0xff]  }
   0xf   :  { %881 = vmatpush3.bf16.msra.mxu0 %v1009_v13  ;;  %v1033_v46 = vld [vmem:[%s1334_s1 + $0x128] sm:$0xff]   ;;  %v1035_v48 = vld [vmem:[%s1334_s1 + $0x120] sm:$0xff]   ;;  %v1036_v49 = vld [vmem:[%s1334_s1 + $0x158] sm:$0xff]  }
  0x10   :  { %882 = vmatprep.subr.bf16.mxu0 %v1012_v16  ;;  %476 = vmatprep.mubr.bf16.mxu0 %v35_v32  ;;  %v1037_v50 = vld [vmem:[%s1334_s1 + $0x118] sm:$0xff]   ;;  %v1038_v51 = vld [vmem:[%s1334_s1 + $0x150] sm:$0xff]   ;;  %v1044_v52 = vld [vmem:[%s1334_s1 + $0x180] sm:$0xff]  }
  0x11   :  { %903 = vmatpush3.bf16.msra.mxu1 %v1011_v15  ;;  %v32_v53 = vld [vmem:[%s1335_s0 + $0x28] sm:$0xff]  ;;  %v33_v55 = vld [vmem:[%s1335_s0 + $0x30] sm:$0xff]  ;;  %v1042_v60 = vld [vmem:[%s1334_s1 + $0x140] sm:$0xff]  }
  0x12   :  { %904 = vmatprep.subr.bf16.mxu1 %v1014_v18  ;;  %v39_v54 = vpack.c.bf16 %v32_v53, %v32_v53  ;;  %v1039_v56 = vld [vmem:[%s1334_s1 + $0x110] sm:$0xff]   ;;  %v40_v57 = vpack.c.bf16 %v33_v55, %v33_v55  ;;  %v1040_v58 = vld [vmem:[%s1334_s1 + $0x148] sm:$0xff]   ;;  %v1043_v61 = vld [vmem:[%s1334_s1 + $0x100] sm:$0xff]  }
  0x13   :  { %883 = vmatpush3.bf16.msra.mxu0 %v1013_v17  ;;  %v1041_v59 = vld [vmem:[%s1334_s1 + $0x108] sm:$0xff]   ;;  %v31_v62 = vld [vmem:[%s1335_s0 + $0x20] sm:$0xff]  ;;  %v1045_v0 = vld [vmem:[%s1336_s3 + $0x38] sm:$0xff]  }
  0x14   :  { %884 = vmatprep.subr.bf16.mxu0 %v1016_v20  ;;  %v38_v63 = vpack.c.bf16 %v31_v62, %v31_v62  ;;  %v1046_v1 = vld [vmem:[%s1336_s3 + $0x30] sm:$0xff]   ;;  %v1047_v2 = vld [vmem:[%s1336_s3 + $0x28] sm:$0xff]   ;;  %v1048_v3 = vld [vmem:[%s1336_s3 + $0x20] sm:$0xff]  }
  0x15   :  { %905 = vmatpush3.bf16.msra.mxu1 %v1015_v19  ;;  %v1049_v4 = vld [vmem:[%s1336_s3 + $0x18] sm:$0xff]   ;;  %v1050_v5 = vld [vmem:[%s1336_s3 + $0x10] sm:$0xff]   ;;  %v1051_v6 = vld [vmem:[%s1336_s3 + $0x8] sm:$0xff]  }
  0x16   :  { %906 = vmatprep.subr.bf16.mxu1 %v1018_v22  ;;  %v1052_v7 = vld [vmem:[%s1336_s3] sm:$0xff]   ;;  %v1053_v8 = vld [vmem:[%s1337_s5 + $0x18] sm:$0xff]   ;;  %v1054_v9 = vld [vmem:[%s1337_s5 + $0x10] sm:$0xff]  }
  0x17   :  { %885 = vmatpush3.bf16.msra.mxu0 %v1017_v21  ;;  %v1056_v37 = vld [vmem:[%s1337_s5] sm:$0xff]  }
  0x18   :  { %886 = vmatprep.subr.bf16.mxu0 %v1020_v24  ;;  %v859_v38 = vld [vmem:[%s1339_s4] ss:$0 sm:$0xff] }
  0x19   :  { %907 = vmatpush3.bf16.msra.mxu1 %v1019_v23  ;;  %v808_v23 = vld [vmem:[%s1338_s2] ss:$0 sm:$0xff] }
  0x1a   :  { %908 = vmatprep.subr.bf16.mxu1 %v1022_v26 }
  0x1b   :  { %887 = vmatpush3.bf16.msra.mxu0 %v1021_v25 }
  0x1c   :  { %888 = vmatprep.subr.bf16.mxu0 %v1024_v28 }
  0x1d   :  { %909 = vmatpush3.bf16.msra.mxu1 %v1023_v27 }
  0x1e   :  { %910 = vmatprep.subr.bf16.mxu1 %v1026_v30 }
  0x1f   :  { %889 = vmatpush3.bf16.msra.mxu0 %v1025_v29 }
  0x20   :  { %918 = vmatprep.subr.bf16.mxu0 %v1028_v36  ;;  %v1055_v36 = vld [vmem:[%s1337_s5 + $0x8] sm:$0xff]  }
  0x21   :  { %911 = vmatpush3.bf16.msra.mxu1 %v1027_v33 }
  0x22   :  { %477 = vmatmul.mubr.bf16.vlgmr.msra.gmra.mxu0 %v34_v35  ;;  %956 = vmatprep.subr.bf16.mxu1 %v1057_v44 }
  0x23   :  { %919 = vmatpush3.bf16.msra.mxu0 %v1029_v39  ;;  %556 = vmatprep.mubr.bf16.mxu0 %v39_v54 }
  0x24   :  { %517 = vmatmul.mubr.bf16.vlgmr.msra.gmra.mxu1 %v36_v41  ;;  %920 = vmatprep.subr.bf16.mxu0 %v1030_v42 }
  0x25   :  { %958 = vmatprep.mubr.msk.bf16.mxu1 %vm1058_vm0, %v1057_v44  ;;  %957 = vmatpush3.bf16.msra.mxu1 %v1044_v52 }
  0x26   :  { %962 = vmatprep.subr.bf16.mxu1 %v1057_v44 }
  0x27   :  { %921 = vmatpush3.bf16.msra.mxu0 %v1031_v43 }
  0x28   :  { %922 = vmatprep.subr.bf16.mxu0 %v1032_v45 }
  0x2b   :  { %923 = vmatpush3.bf16.msra.mxu0 %v1033_v46 }
  0x2c   :  { %924 = vmatprep.subr.bf16.mxu0 %v1034_v47  ;;  %959 = vmatmul.mubr.msk.bf16.vlgmr.msra.gmra.mxu1 %vm440_vm1, %v40_v57 }
  0x2d   :  { %978 = vmatprep.mubr.msk.bf16.mxu1 %vm1058_vm0, %v1057_v44  ;;  %963 = vmatpush3.bf16.msra.mxu1 %v1045_v0 }
  0x2e   :  { %964 = vmatprep.subr.bf16.mxu1 %v1057_v44 }
  0x2f   :  { %925 = vmatpush3.bf16.msra.mxu0 %v1035_v48 }
  0x30   :  { %926 = vmatprep.subr.bf16.mxu0 %v1036_v49 }
  0x31   :  { %965 = vmatpush3.bf16.msra.mxu1 %v1046_v1 }
  0x32   :  { %966 = vmatprep.subr.bf16.mxu1 %v1057_v44 }
  0x33   :  { %927 = vmatpush3.bf16.msra.mxu0 %v1037_v50 }
  0x34   :  { %928 = vmatprep.subr.bf16.mxu0 %v1038_v51 }
  0x35   :  { %967 = vmatpush3.bf16.msra.mxu1 %v1047_v2 }
  0x36   :  { %968 = vmatprep.subr.bf16.mxu1 %v1057_v44 }
  0x37   :  { %929 = vmatpush3.bf16.msra.mxu0 %v1039_v56 }
  0x38   :  { %930 = vmatprep.subr.bf16.mxu0 %v1040_v58 }
  0x39   :  { %969 = vmatpush3.bf16.msra.mxu1 %v1048_v3 }
  0x3a   :  { %970 = vmatprep.subr.bf16.mxu1 %v1057_v44 }
  0x3b   :  { %931 = vmatpush3.bf16.msra.mxu0 %v1041_v59 }
  0x3c   :  { %932 = vmatprep.subr.bf16.mxu0 %v1042_v60 }
  0x3d   :  { %971 = vmatpush3.bf16.msra.mxu1 %v1049_v4 }
  0x3e   :  { %972 = vmatprep.subr.bf16.mxu1 %v1057_v44 }
  0x3f   :  { %933 = vmatpush3.bf16.msra.mxu0 %v1043_v61 }
  0x40   :  { %982 = vmatprep.subr.bf16.mxu0 %v1057_v44 }
  0x41   :  { %973 = vmatpush3.bf16.msra.mxu1 %v1050_v5 }
  0x42   :  { %557 = vmatmul.mubr.bf16.vlgmr.msra.gmra.mxu0 %v38_v63  ;;  %974 = vmatprep.subr.bf16.mxu1 %v1057_v44 }
  0x43   :  { %990 = vmatprep.mubr.msk.bf16.mxu0 %vm1058_vm0, %v1057_v44  ;;  %983 = vmatpush3.bf16.msra.mxu0 %v1053_v8 }
  0x44   :  { %984 = vmatprep.subr.bf16.mxu0 %v1057_v44 }
  0x45   :  { %975 = vmatpush3.bf16.msra.mxu1 %v1051_v6 }
  0x46   :  { %976 = vmatprep.subr.bf16.mxu1 %v1057_v44 }
  0x47   :  { %985 = vmatpush3.bf16.msra.mxu0 %v1054_v9 }
  0x48   :  { %986 = vmatprep.subr.bf16.mxu0 %v1057_v44 }
  0x49   :  { %977 = vmatpush3.bf16.msra.mxu1 %v1052_v7 }
  0x4b   :  { %987 = vmatpush3.bf16.msra.mxu0 %v1055_v36 }
  0x4c   :  { %988 = vmatprep.subr.bf16.mxu0 %v1057_v44  ;;  %v868_v44 = vld [vmem:[%s1340_s6] ss:$0 sm:$0xff] }
  0x4f   :  { %989 = vmatpush3.bf16.msra.mxu0 %v1056_v37 }
  0xe2   :  { %v890_v10 = vpop.f32.mrf.mxu0 }
  0xe4   :  { %v891_v11 = vpop.f32.mrf.mxu0  ;;  %v912_v12 = vpop.f32.mrf.mxu1 }
  0xe5   :  { %v892_v22 = vadd.f32 %v891_v11, %v890_v10 }
  0xe6   :  { %v893_v13 = vpop.f32.mrf.mxu0  ;;  %v913_v14 = vpop.f32.mrf.mxu1 }
  0xe7   :  { %v479_v24 = vadd.f32 %v892_v22, %v808_v23  ;;  %v914_v25 = vadd.f32 %v913_v14, %v912_v12 }
  0xe8   :  { %v894_v15 = vpop.f32.mrf.mxu0  ;;  %v915_v16 = vpop.f32.mrf.mxu1 }
  0xe9   :  { %v519_v28 = vadd.f32 %v914_v25, %v479_v24 }
  0xea   :  { %v916_v17 = vpop.f32.mrf.mxu1 }
  0xec   :  { %v598_v18 = vpop.f32.mrf.mxu1 }
  0xee   :  { %v960_v19 = vpop.f32.mrf.mxu1 }
  0xf0   :  { %v601_v20 = vpop.f32.mrf.mxu1 }
  0xf2   :  { %v961_v21 = vpop.f32.mrf.mxu1 }
 0x102   :  { %v934_v26 = vpop.f32.mrf.mxu0 }
 0x104   :  { %v935_v27 = vpop.f32.mrf.mxu0 }
 0x105   :  { %v936_v29 = vadd.f32 %v935_v27, %v934_v26 }
 0x106   :  { %v937_v30 = vpop.f32.mrf.mxu0 }
 0x107   :  { %v559_v31 = vadd.f32 %v936_v29, %v519_v28 }
 0x108   :  { %v938_v32 = vpop.f32.mrf.mxu0 }
 0x109   :  { %v599_v33 = vadd.f32 %v598_v18, %v559_v31 }
 0x10b   :  { %v604_v34 = vmax.f32 %v599_v33, 0.0 }
 0x10d   :  { %v605_v35 = vpack.c.bf16 %v604_v34, %v604_v34 }
 0x10f   :  { %979 = vmatmul.mubr.bf16.vlgmr.msra.gmra.mxu1 %v605_v35 }
 0x1cf   :  { %v711_v39 = vpop.f32.mrf.mxu1 }
 0x1d0   :  { %v712_v40 = vadd.f32 %v859_v38, %v711_v39 }
 0x1d1   :  { %v980_v41 = vpop.f32.mrf.mxu1 }
 0x1d2   :  { %v717_v42 = vmax.f32 %v712_v40, 0.0 }
 0x1d3   :  { %v714_v43 = vpop.f32.mrf.mxu1 }
 0x1d4   :  { %v718_v45 = vpack.c.bf16 %v717_v42, %v717_v42 }
 0x1d5   :  { %v981_v46 = vpop.f32.mrf.mxu1 }
 0x1d6   :  { %991 = vmatmul.mubr.msk.bf16.vlgmr.msra.gmra.mxu0 %vm758_vm2, %v718_v45 }
 0x296   :  { %v796_v47 = vpop.f32.mrf.mxu0 }
 0x297   :  { %v797_v48 = vadd.f32 %v868_v44, %v796_v47 }
 0x298   :  { %v992_v49 = vpop.f32.mrf.mxu0 }
 0x299   :  { %v802_v50 = vpack.c.bf16 %v797_v48, %v797_v48 }
 0x29a   :  { %v799_v51 = vpop.f32.mrf.mxu0 }
 0x29b   :  { %803 = vst [vmem:[%s1341_s7] sm:$0xf] %v802_v50 }
 0x29c   :  { %v993_v52 = vpop.f32.mrf.mxu0 }

</bundles_post_ra>
